<compile_context>
chip_gen: v7x
topology: tpu7x:2x2x1
jax: 0.10.0
libtpu: 0.0.40
codegen_flags: <defaults>
</compile_context>

<pallas_src>
import jax
import jax.numpy as jnp
from jax.experimental import pallas as pl
from jax.experimental.pallas import tpu as pltpu


def _copy_kernel(src_ref, o_ref):
    # The entire forward pass is just materializing the constant.
    o_ref[...] = src_ref[...]


_GRID_ROW_THRESHOLD = 4096   # go gridded above ~2 MiB of f32 (VMEM safety on v7x)
_TILE_ROWS = 512             # lane-dense (512, 128) tiles for the gridded path


def _lane_dense_shape(shape, dtype):
    """Return a (rows, 128) slab shape if it packs into whole vregs, else None."""
    lanes = 128
    n = 1
    for d in shape:
        n *= d
    itemsize = jnp.dtype(dtype).itemsize
    sublane_multiple = 32 // itemsize   # 8 for f32, 16 for bf16, 32 for int8/fp8
    if n % lanes == 0 and (n // lanes) % sublane_multiple == 0:
        return (n // lanes, lanes)
    return None


def _forward_impl(x, expected_output):
    """Pallas equivalent of FakeModel.forward: returns expected_output.

    Fastest possible implementation is `return expected_output` with no kernel;
    the pallas_call is kept only as the required explicit kernel boundary and
    is a single lane-dense identity copy with no DMA of the unused input x.
    """
    del x  # FakeModel ignores its input; never DMA it.

    work_shape = _lane_dense_shape(expected_output.shape, expected_output.dtype)
    if work_shape is None:
        # Fallback: natural layout (block_shape == full array dims is legal).
        work_shape = expected_output.shape

    flat = expected_output.reshape(work_shape)
    ndim = len(work_shape)

    if (ndim == 2
            and work_shape[0] >= _GRID_ROW_THRESHOLD
            and work_shape[0] % _TILE_ROWS == 0):
        # Large constant: parallel, lane-dense grid so the copy stays at the
        # HBM roofline and per-core VMEM stays bounded (v7x: 64 MiB physical).
        rows = work_shape[0]
        out_flat = pl.pallas_call(
            _copy_kernel,
            out_shape=jax.ShapeDtypeStruct(flat.shape, flat.dtype),
            grid=(rows // _TILE_ROWS,),
            in_specs=[pl.BlockSpec((_TILE_ROWS, 128), lambda i: (i, 0))],
            out_specs=pl.BlockSpec((_TILE_ROWS, 128), lambda i: (i, 0)),
            compiler_params=pltpu.CompilerParams(
                dimension_semantics=("parallel",)),
        )(flat)
    else:
        # Small constant (test path): one un-gridded, lane-dense block.
        out_flat = pl.pallas_call(
            _copy_kernel,
            out_shape=jax.ShapeDtypeStruct(flat.shape, flat.dtype),
            in_specs=[pl.BlockSpec(flat.shape, lambda: (0,) * ndim)],
            out_specs=pl.BlockSpec(flat.shape, lambda: (0,) * ndim),
        )(flat)

    return out_flat.reshape(expected_output.shape)


# Jit the whole wrapper: reshapes fuse to bitcasts and there is one dispatch.
fake_model_forward = jax.jit(_forward_impl)


if __name__ == "__main__":
    key = jax.random.PRNGKey(0)
    kx, kexp = jax.random.split(key)

    # Small shapes consistent with a typical NCHW forward.
    x = jax.random.normal(kx, (2, 4, 16, 16), dtype=jnp.float32)
    expected_output = jax.random.normal(kexp, (2, 4, 16, 16), dtype=jnp.float32)

    out = fake_model_forward(x, expected_output)
    out = jax.block_until_ready(out)

    assert out.shape == expected_output.shape
    assert out.dtype == expected_output.dtype
    assert bool(jnp.array_equal(out, expected_output))

    print("KERNEL_OK")
</pallas_src>

<mosaic_0001>
module attributes {stable_mosaic.version = 11 : i64} {
  func.func @_copy_kernel(%arg0: memref<16x128xf32, #tpu.memory_space<vmem>>, %arg1: memref<16x128xf32, #tpu.memory_space<vmem>>) attributes {dimension_semantics = [], scalar_prefetch = 0 : i64, scratch_operands = 0 : i64, tpu.core_type = #tpu.core_type<tc>} {
    %c0 = arith.constant 0 : index
    %c0_0 = arith.constant 0 : index
    %0 = vector.load %arg0[%c0, %c0_0] : memref<16x128xf32, #tpu.memory_space<vmem>>, vector<16x128xf32>
    %c0_1 = arith.constant 0 : index
    %c0_2 = arith.constant 0 : index
    %1 = vector.load %arg1[%c0_1, %c0_2] : memref<16x128xf32, #tpu.memory_space<vmem>>, vector<16x128xf32>
    tpu.vector_store %arg1[%c0_1, %c0_2], %0 {strides = array<i32>} : memref<16x128xf32, #tpu.memory_space<vmem>>, vector<16x128xf32>,
    return
  }
}

</mosaic_0001>

<bundles_post_ra>
// kernel: _forward_impl.1
= control target key start
LH: loop header
LB: loop body
LE: loop exit
PB: predicated region body
PF: predicated region fallthrough
CT: control target
= control target key end

     0   :  { %s38_s0 = inlined_call_operand.vmem [shape: f32[16,128], index: 0, kind: input, shape index: {}]   ;;  %s39_s1 = inlined_call_operand.vmem [shape: f32[16,128], index: 1, kind: output, shape index: {}]  }
   0x1   :  { %v8_v0 = vld [vmem:[%s38_s0] sm:$0xff]  ;;  %v9_v1 = vld [vmem:[%s38_s0 + $0x8] sm:$0xff] }
   0x2   :  { %10 = vst [vmem:[%s39_s1] sm:$0xff] %v8_v0  ;;  %11 = vst [vmem:[%s39_s1 + $0x8] sm:$0xff] %v9_v1 }

</bundles_post_ra>
